<compile_context>
chip_gen: v6e
topology: v6e:2x2x1
jax: 0.10.0
libtpu: 0.0.40
codegen_flags: <defaults>
</compile_context>

<pallas_src>
import math

import jax
import jax.numpy as jnp
from jax.experimental import pallas as pl
from jax.experimental.pallas import tpu as pltpu


# ----------------------------------------------------------------------------
# Kernel
# ----------------------------------------------------------------------------
def _forward_kernel(u_ref, i_ref, ue_ref, ie_ref, pe_ref, ce_ref,
                    wt_ref, b_ref, out_ref):
    """All embedding refs are (block_b, F) — exactly the XLA gather layout.

    wt_ref : (F, env_num + 1)   column 0 is all-ones (folds sum(prefs) into the
                                classifier matmul); columns 1.. are W^T.
    b_ref  : (1, env_num + 1)   column 0 is 0; columns 1.. are the bias.
    out_ref: (block_b, env_num + 2)
             col 0 = mf_score, col 1 = env_aware_score, cols 2.. = env_outputs.
    """
    envs = pe_ref[...] * ce_ref[...]                                     # (Bt, F)

    mf = jnp.sum(u_ref[...] * i_ref[...] * envs, axis=1, keepdims=True)  # (Bt, 1)

    prefs = ue_ref[...] * ie_ref[...] * envs                             # (Bt, F)
    z = jnp.dot(prefs, wt_ref[...],
                preferred_element_type=jnp.float32) + b_ref[...]         # (Bt, E+1)

    out_ref[...] = jnp.concatenate(
        [jnp.maximum(mf, 0.0),            # mf_score
         jnp.maximum(z[:, :1], 0.0),      # env_aware_score (ones-column of W^T)
         z[:, 1:]],                       # env_outputs
        axis=1)


# ----------------------------------------------------------------------------
# Parameter init (mirrors _init_weight of the PyTorch module, deterministic)
# ----------------------------------------------------------------------------
def init_params(user_num, item_num, pop_env_num, con_env_num, factor_num, key):
    env_num = pop_env_num + con_env_num
    ks = jax.random.split(key, 8)
    std = 0.01
    xavier = math.sqrt(6.0 / (factor_num + env_num))
    bias_bound = 1.0 / math.sqrt(factor_num)
    return {
        "user_emb":       (std * jax.random.normal(ks[0], (user_num, factor_num))).astype(jnp.float32),
        "item_emb":       (std * jax.random.normal(ks[1], (item_num, factor_num))).astype(jnp.float32),
        "user_env_emb":   (std * jax.random.normal(ks[2], (user_num, factor_num))).astype(jnp.float32),
        "item_env_emb":   (std * jax.random.normal(ks[3], (item_num, factor_num))).astype(jnp.float32),
        "pop_env2hidden": (std * jax.random.normal(ks[4], (pop_env_num, factor_num))).astype(jnp.float32),
        "con_env2hidden": (std * jax.random.normal(ks[5], (con_env_num, factor_num))).astype(jnp.float32),
        "cls_w": jax.random.uniform(ks[6], (env_num, factor_num),
                                    minval=-xavier, maxval=xavier).astype(jnp.float32),
        "cls_b": jax.random.uniform(ks[7], (env_num,),
                                    minval=-bias_bound, maxval=bias_bound).astype(jnp.float32),
    }


# ----------------------------------------------------------------------------
# Tiling helpers (generation-aware VMEM budget)
# ----------------------------------------------------------------------------
def _vmem_budget_and_limit():
    """(working-set budget, vmem_limit_bytes) sized per TPU generation."""
    try:
        kind = jax.devices()[0].device_kind.lower()
    except Exception:  # pragma: no cover - defensive
        kind = ""
    if any(g in kind for g in ("v4", "v5", "v6")):
        phys = 128 << 20          # v4 / v5e / v6e: 128 MiB VMEM per TensorCore
    else:
        phys = 64 << 20           # v7x (and conservative default): 64 MiB
    budget = min(phys // 2, 48 << 20)
    limit = min(phys, budget + (16 << 20))
    return budget, limit


def _pick_block_b(batch, factor_num, env_num, budget_bytes):
    """Largest 128-multiple batch tile whose double-buffered f32 working set
    fits `budget_bytes`, capped at 4096, and clamped so batches >= 256 rows get
    at least 2 grid steps (both v7x TensorCores stay busy)."""
    per_row = 4 * (6 * factor_num + (env_num + 2)) * 2   # x2: double buffering
    bb = (budget_bytes // per_row // 128) * 128
    bb = max(128, min(4096, bb))
    b128 = pl.cdiv(batch, 128) * 128
    if b128 >= 256:
        half = (pl.cdiv(b128, 2) // 128) * 128
        bb = min(bb, max(128, half))
    return min(bb, b128)


# ----------------------------------------------------------------------------
# Wrapper
# ----------------------------------------------------------------------------
@jax.jit
def forward(params, users_id, items_id, pop_envs_id, con_envs_id):
    F = params["user_emb"].shape[1]
    env_num = params["cls_w"].shape[0]
    B = users_id.shape[0]

    budget, vmem_limit = _vmem_budget_and_limit()
    block_b = _pick_block_b(B, F, env_num, budget)
    b_pad = pl.cdiv(B, block_b) * block_b

    # Pad the cheap int32 index vectors (NOT the gathered f32 streams).
    pad = b_pad - B
    if pad:
        padi = lambda ids: jnp.pad(ids, (0, pad))  # pad with index 0 (valid row)
        users_id, items_id, pop_envs_id, con_envs_id = map(
            padi, (users_id, items_id, pop_envs_id, con_envs_id))

    # Gathers stay in their natural (b_pad, F) layout — no transpose/pad copies.
    u  = params["user_emb"][users_id]
    it = params["item_emb"][items_id]
    ue = params["user_env_emb"][users_id]
    ie = params["item_env_emb"][items_id]
    pe = params["pop_env2hidden"][pop_envs_id]
    ce = params["con_env2hidden"][con_envs_id]

    # Classifier weights with an all-ones column prepended (folds the
    # env_aware_score reduction into the matmul); matching zero bias entry.
    wt_aug = jnp.concatenate(
        [jnp.ones((F, 1), jnp.float32), params["cls_w"].T], axis=1)      # (F, E+1)
    b_aug = jnp.concatenate(
        [jnp.zeros((1,), jnp.float32), params["cls_b"]])[None, :]        # (1, E+1)

    grid = (b_pad // block_b,)
    emb_spec = pl.BlockSpec((block_b, F), lambda g: (g, 0))

    cost = pl.CostEstimate(
        flops=int(b_pad * (2 * (env_num + 1) * F + 8 * F + 2 * (env_num + 2))),
        transcendentals=0,
        bytes_accessed=int(4 * (6 * b_pad * F
                                + F * (env_num + 1) + (env_num + 1)
                                + b_pad * (env_num + 2))),
    )

    out = pl.pallas_call(
        _forward_kernel,
        out_shape=jax.ShapeDtypeStruct((b_pad, env_num + 2), jnp.float32),
        grid=grid,
        in_specs=[emb_spec] * 6 + [
            pl.BlockSpec((F, env_num + 1), lambda g: (0, 0)),   # W^T (+ ones col)
            pl.BlockSpec((1, env_num + 1), lambda g: (0, 0)),   # bias (+ zero)
        ],
        out_specs=pl.BlockSpec((block_b, env_num + 2), lambda g: (g, 0)),
        compiler_params=pltpu.CompilerParams(
            dimension_semantics=("parallel",),   # shards blocks across v7x TCs
            vmem_limit_bytes=int(vmem_limit),
        ),
        cost_estimate=cost,
    )(u, it, ue, ie, pe, ce, wt_aug, b_aug)

    mf_score = out[:B, 0]            # (B,)
    env_aware_score = out[:B, 1]     # (B,)
    env_outputs = out[:B, 2:]        # (B, env_num)
    return mf_score, env_aware_score, env_outputs


# ----------------------------------------------------------------------------
# Pure-JAX reference (mirrors the PyTorch forward)
# ----------------------------------------------------------------------------
def forward_ref(params, users_id, items_id, pop_envs_id, con_envs_id):
    u = params["user_emb"][users_id]
    i = params["item_emb"][items_id]
    pe = params["pop_env2hidden"][pop_envs_id]
    ce = params["con_env2hidden"][con_envs_id]
    envs = pe * ce
    mf = jax.nn.relu(jnp.sum(u * i * envs, axis=1))
    ue = params["user_env_emb"][users_id]
    ie = params["item_env_emb"][items_id]
    prefs = ue * ie * envs
    envsc = jax.nn.relu(jnp.sum(prefs, axis=1))
    envout = prefs @ params["cls_w"].T + params["cls_b"]
    return mf, envsc, envout


if __name__ == "__main__":
    user_num, item_num = 48, 64
    pop_env_num, con_env_num = 2, 3
    factor_num = 32
    batch = 8

    key = jax.random.PRNGKey(0)
    kp, k1, k2, k3, k4 = jax.random.split(key, 5)
    params = init_params(user_num, item_num, pop_env_num, con_env_num, factor_num, kp)

    users_id    = jax.random.randint(k1, (batch,), 0, user_num,    dtype=jnp.int32)
    items_id    = jax.random.randint(k2, (batch,), 0, item_num,    dtype=jnp.int32)
    pop_envs_id = jax.random.randint(k3, (batch,), 0, pop_env_num, dtype=jnp.int32)
    con_envs_id = jax.random.randint(k4, (batch,), 0, con_env_num, dtype=jnp.int32)

    mf_score, env_score, env_outputs = forward(params, users_id, items_id,
                                               pop_envs_id, con_envs_id)
    jax.block_until_ready((mf_score, env_score, env_outputs))

    mf_ref, env_ref, out_ref = forward_ref(params, users_id, items_id,
                                           pop_envs_id, con_envs_id)

    assert mf_score.shape == (batch,)
    assert env_score.shape == (batch,)
    assert env_outputs.shape == (batch, pop_env_num + con_env_num)
    assert jnp.allclose(mf_score, mf_ref, atol=1e-5, rtol=1e-5)
    assert jnp.allclose(env_score, env_ref, atol=1e-5, rtol=1e-5)
    assert jnp.allclose(env_outputs, out_ref, atol=1e-5, rtol=1e-5)

    print("KERNEL_OK")
</pallas_src>

<mosaic_0001>
module attributes {stable_mosaic.version = 11 : i64} {
  func.func @_forward_kernel(%arg0: i32, %arg1: memref<128x32xf32, #tpu.memory_space<vmem>>, %arg2: memref<128x32xf32, #tpu.memory_space<vmem>>, %arg3: memref<128x32xf32, #tpu.memory_space<vmem>>, %arg4: memref<128x32xf32, #tpu.memory_space<vmem>>, %arg5: memref<128x32xf32, #tpu.memory_space<vmem>>, %arg6: memref<128x32xf32, #tpu.memory_space<vmem>>, %arg7: memref<32x6xf32, #tpu.memory_space<vmem>>, %arg8: memref<1x6xf32, #tpu.memory_space<vmem>>, %arg9: memref<128x7xf32, #tpu.memory_space<vmem>>) attributes {dimension_semantics = [#tpu.dimension_semantics<parallel>], iteration_bounds = array<i64: 1>, scalar_prefetch = 0 : i64, scratch_operands = 0 : i64, tpu.core_type = #tpu.core_type<tc>, window_params = [{transform_indices = @transform_0, window_bounds = array<i64: 128, 32>}, {transform_indices = @transform_1, window_bounds = array<i64: 128, 32>}, {transform_indices = @transform_2, window_bounds = array<i64: 128, 32>}, {transform_indices = @transform_3, window_bounds = array<i64: 128, 32>}, {transform_indices = @transform_4, window_bounds = array<i64: 128, 32>}, {transform_indices = @transform_5, window_bounds = array<i64: 128, 32>}, {pipeline_mode = #tpu.pipeline_mode<synchronous>, transform_indices = @transform_6, window_bounds = array<i64: 32, 6>}, {pipeline_mode = #tpu.pipeline_mode<synchronous>, transform_indices = @transform_7, window_bounds = array<i64: 1, 6>}, {transform_indices = @transform_8, window_bounds = array<i64: 128, 7>}]} {
    %c0 = arith.constant 0 : index
    %c0_0 = arith.constant 0 : index
    %0 = vector.load %arg5[%c0, %c0_0] : memref<128x32xf32, #tpu.memory_space<vmem>>, vector<128x32xf32>
    %c0_1 = arith.constant 0 : index
    %c0_2 = arith.constant 0 : index
    %1 = vector.load %arg6[%c0_1, %c0_2] : memref<128x32xf32, #tpu.memory_space<vmem>>, vector<128x32xf32>
    %2 = arith.mulf %0, %1 : vector<128x32xf32>
    %c0_3 = arith.constant 0 : index
    %c0_4 = arith.constant 0 : index
    %3 = vector.load %arg1[%c0_3, %c0_4] : memref<128x32xf32, #tpu.memory_space<vmem>>, vector<128x32xf32>
    %c0_5 = arith.constant 0 : index
    %c0_6 = arith.constant 0 : index
    %4 = vector.load %arg2[%c0_5, %c0_6] : memref<128x32xf32, #tpu.memory_space<vmem>>, vector<128x32xf32>
    %5 = arith.mulf %3, %4 : vector<128x32xf32>
    %6 = arith.mulf %5, %2 : vector<128x32xf32>
    %cst = arith.constant dense<0.000000e+00> : vector<128xf32>
    %7 = vector.multi_reduction <add>, %6, %cst [1] : vector<128x32xf32> to vector<128xf32>
    %8 = vector.shape_cast %7 : vector<128xf32> to vector<128x1xf32>
    %c0_7 = arith.constant 0 : index
    %c0_8 = arith.constant 0 : index
    %9 = vector.load %arg3[%c0_7, %c0_8] : memref<128x32xf32, #tpu.memory_space<vmem>>, vector<128x32xf32>
    %c0_9 = arith.constant 0 : index
    %c0_10 = arith.constant 0 : index
    %10 = vector.load %arg4[%c0_9, %c0_10] : memref<128x32xf32, #tpu.memory_space<vmem>>, vector<128x32xf32>
    %11 = arith.mulf %9, %10 : vector<128x32xf32>
    %12 = arith.mulf %11, %2 : vector<128x32xf32>
    %c0_11 = arith.constant 0 : index
    %c0_12 = arith.constant 0 : index
    %13 = vector.load %arg7[%c0_11, %c0_12] : memref<32x6xf32, #tpu.memory_space<vmem>>, vector<32x6xf32>
    %cst_13 = arith.constant dense<0.000000e+00> : vector<128x6xf32>
    %14 = tpu.matmul %12, %13, %cst_13 {dimension_numbers = #tpu.dot_dimension_numbers<[1], [0], [0], [1], [0, 0, 1, 1], [], []>} : vector<128x32xf32>, vector<32x6xf32>, vector<128x6xf32> -> vector<128x6xf32>
    %c0_14 = arith.constant 0 : index
    %c0_15 = arith.constant 0 : index
    %15 = vector.load %arg8[%c0_14, %c0_15] : memref<1x6xf32, #tpu.memory_space<vmem>>, vector<1x6xf32>
    %16 = vector.broadcast %15 : vector<1x6xf32> to vector<128x6xf32>
    %17 = arith.addf %14, %16 : vector<128x6xf32>
    %cst_16 = arith.constant 0.000000e+00 : f32
    %18 = vector.broadcast %cst_16 : f32 to vector<128x1xf32>
    %19 = arith.maximumf %8, %18 : vector<128x1xf32>
    %20 = vector.extract_strided_slice %17 {offsets = [0, 0], sizes = [128, 1], strides = [1, 1]} : vector<128x6xf32> to vector<128x1xf32>
    %cst_17 = arith.constant 0.000000e+00 : f32
    %21 = vector.broadcast %cst_17 : f32 to vector<128x1xf32>
    %22 = arith.maximumf %20, %21 : vector<128x1xf32>
    %23 = vector.extract_strided_slice %17 {offsets = [0, 1], sizes = [128, 5], strides = [1, 1]} : vector<128x6xf32> to vector<128x5xf32>
    %24 = tpu.concatenate %19, %22, %23 in 1 : vector<128x1xf32>, vector<128x1xf32>, vector<128x5xf32> -> vector<128x7xf32>
    %c0_18 = arith.constant 0 : index
    %c0_19 = arith.constant 0 : index
    %25 = vector.load %arg9[%c0_18, %c0_19] : memref<128x7xf32, #tpu.memory_space<vmem>>, vector<128x7xf32>
    tpu.vector_store %arg9[%c0_18, %c0_19], %24 {strides = array<i32>} : memref<128x7xf32, #tpu.memory_space<vmem>>, vector<128x7xf32>,
    return
  }
  func.func @transform_0(%arg0: i32) -> (i32, i32) {
    %c0_i32 = arith.constant 0 : i32
    %c0_i32_0 = arith.constant 0 : i32
    return %arg0, %c0_i32 : i32, i32
  }
  func.func @transform_1(%arg0: i32) -> (i32, i32) {
    %c0_i32 = arith.constant 0 : i32
    %c0_i32_0 = arith.constant 0 : i32
    return %arg0, %c0_i32 : i32, i32
  }
  func.func @transform_2(%arg0: i32) -> (i32, i32) {
    %c0_i32 = arith.constant 0 : i32
    %c0_i32_0 = arith.constant 0 : i32
    return %arg0, %c0_i32 : i32, i32
  }
  func.func @transform_3(%arg0: i32) -> (i32, i32) {
    %c0_i32 = arith.constant 0 : i32
    %c0_i32_0 = arith.constant 0 : i32
    return %arg0, %c0_i32 : i32, i32
  }
  func.func @transform_4(%arg0: i32) -> (i32, i32) {
    %c0_i32 = arith.constant 0 : i32
    %c0_i32_0 = arith.constant 0 : i32
    return %arg0, %c0_i32 : i32, i32
  }
  func.func @transform_5(%arg0: i32) -> (i32, i32) {
    %c0_i32 = arith.constant 0 : i32
    %c0_i32_0 = arith.constant 0 : i32
    return %arg0, %c0_i32 : i32, i32
  }
  func.func @transform_6(%arg0: i32) -> (i32, i32) {
    %c0_i32 = arith.constant 0 : i32
    %c0_i32_0 = arith.constant 0 : i32
    %c0_i32_1 = arith.constant 0 : i32
    return %c0_i32, %c0_i32_0 : i32, i32
  }
  func.func @transform_7(%arg0: i32) -> (i32, i32) {
    %c0_i32 = arith.constant 0 : i32
    %c0_i32_0 = arith.constant 0 : i32
    %c0_i32_1 = arith.constant 0 : i32
    return %c0_i32, %c0_i32_0 : i32, i32
  }
  func.func @transform_8(%arg0: i32) -> (i32, i32) {
    %c0_i32 = arith.constant 0 : i32
    %c0_i32_0 = arith.constant 0 : i32
    return %arg0, %c0_i32 : i32, i32
  }
}

</mosaic_0001>

<bundles_post_ra>
// kernel: forward.1
= control target key start
LH: loop header
LB: loop body
LE: loop exit
PB: predicated region body
PF: predicated region fallthrough
CT: control target
= control target key end

     0   :  { %vm141_vm0 = vcmask 261120   ;;  %s751_s9 = smov 1   ;;  %vm618_vm1 = vcmask 7168   ;;  %vm635_vm2 = vcmask 15360   ;;  %vm652_vm3 = vcmask 56320   ;;  %s1369_s6 = inlined_call_operand.vmem [shape: f32[32,6], index: 6, kind: input, shape index: {}]   ;;  %s1370_s2 = inlined_call_operand.vmem [shape: f32[128,32], index: 2, kind: input, shape index: {}]   ;;  %s1371_s3 = inlined_call_operand.vmem [shape: f32[128,32], index: 3, kind: input, shape index: {}]   ;;  %s1372_s4 = inlined_call_operand.vmem [shape: f32[128,32], index: 4, kind: input, shape index: {}]   ;;  %s1373_s5 = inlined_call_operand.vmem [shape: f32[128,32], index: 5, kind: input, shape index: {}]   ;;  %s1374_s0 = inlined_call_operand.vmem [shape: f32[128,32], index: 0, kind: input, shape index: {}]   ;;  %s1375_s1 = inlined_call_operand.vmem [shape: f32[128,32], index: 1, kind: input, shape index: {}]   ;;  %s1376_s7 = inlined_call_operand.vmem [shape: f32[1,6], index: 7, kind: input, shape index: {}]   ;;  %s1377_s8 = inlined_call_operand.vmem [shape: f32[128,7], index: 8, kind: output, shape index: {}]  }
   0x1   :  { %v257_v0 = vld [vmem:[%s1369_s6 + $0x18] sm:$0xff]  ;;  %v256_v1 = vld [vmem:[%s1369_s6 + $0x10] sm:$0xff]  ;;  %v255_v2 = vld [vmem:[%s1369_s6 + $0x8] sm:$0xff] }
   0x2   :  { %710 = vmatprep.subr.mxu0 %v257_v0  ;;  %742 = vmatprep.subr.mxu1 %v257_v0  ;;  %v29_v3 = vld [vmem:[%s1372_s4] sm:$0xff]  ;;  %v30_v9 = vld [vmem:[%s1372_s4 + $0x8] sm:$0xff]  ;;  %v31_v29 = vld [vmem:[%s1372_s4 + $0x10] sm:$0xff] }
   0x3   :  { %v45_v4 = vld [vmem:[%s1373_s5] sm:$0xff]  ;;  %711 = vmatpush3.msra.mxu0 %v257_v0  ;;  %746 = vmatpush3.msra.mxu1 %v257_v0  ;;  %v46_v11 = vld [vmem:[%s1373_s5 + $0x8] sm:$0xff]  ;;  %v47_v31 = vld [vmem:[%s1373_s5 + $0x10] sm:$0xff] }
   0x4   :  { %v254_v5 = vld [vmem:[%s1369_s6] sm:$0xff]  ;;  %v815_v6 = vmul.f32 %v45_v4, %v29_v3  ;;  %712 = vmatprep.subr.mxu0 %v256_v1  ;;  %743 = vmatprep.subr.mxu1 %v256_v1  ;;  %v191_v12 = vld [vmem:[%s1370_s2 + $0x8] sm:$0xff]  ;;  %v835_v14 = vmul.f32 %v46_v11, %v30_v9  ;;  %v192_v32 = vld [vmem:[%s1370_s2 + $0x10] sm:$0xff]  ;;  %v881_v35 = vmul.f32 %v47_v31, %v31_v29 }
   0x5   :  { %v190_v7 = vld [vmem:[%s1370_s2] sm:$0xff]  ;;  %v207_v13 = vld [vmem:[%s1371_s3 + $0x8] sm:$0xff]  ;;  %713 = vmatpush3.msra.mxu0 %v256_v1  ;;  %747 = vmatpush3.msra.mxu1 %v256_v1  ;;  %v208_v33 = vld [vmem:[%s1371_s3 + $0x10] sm:$0xff] }
   0x6   :  { %v206_v8 = vld [vmem:[%s1371_s3] sm:$0xff]  ;;  %v223_v15 = vmul.f32 %v207_v13, %v191_v12  ;;  %714 = vmatprep.subr.mxu0 %v255_v2  ;;  %744 = vmatprep.subr.mxu1 %v255_v2  ;;  %v38_v22 = vld [vmem:[%s1372_s4 + $0x48] sm:$0xff]  ;;  %v224_v36 = vmul.f32 %v208_v33, %v192_v32  ;;  %v32_v37 = vld [vmem:[%s1372_s4 + $0x18] sm:$0xff] }
   0x7   :  { %v222_v10 = vmul.f32 %v206_v8, %v190_v7  ;;  %v37_v16 = vld [vmem:[%s1372_s4 + $0x40] sm:$0xff]  ;;  %v54_v23 = vld [vmem:[%s1373_s5 + $0x48] sm:$0xff]  ;;  %715 = vmatpush3.msra.mxu0 %v255_v2  ;;  %748 = vmatpush3.msra.mxu1 %v255_v2  ;;  %v48_v38 = vld [vmem:[%s1373_s5 + $0x18] sm:$0xff] }
   0x8   :  { %v53_v17 = vld [vmem:[%s1373_s5 + $0x40] sm:$0xff]  ;;  %v239_v24 = vmul.f32 %v223_v15, %v835_v14  ;;  %v859_v26 = vmul.f32 %v54_v23, %v38_v22  ;;  %v199_v27 = vld [vmem:[%s1370_s2 + $0x48] sm:$0xff]  ;;  %716 = vmatprep.subr.mxu0 %v254_v5  ;;  %745 = vmatprep.subr.mxu1 %v254_v5  ;;  %v193_v39 = vld [vmem:[%s1370_s2 + $0x18] sm:$0xff]  ;;  %v894_v41 = vmul.f32 %v48_v38, %v32_v37 }
   0x9   :  { %v198_v18 = vld [vmem:[%s1370_s2 + $0x40] sm:$0xff]  ;;  %v238_v19 = vmul.f32 %v222_v10, %v815_v6  ;;  %v847_v20 = vmul.f32 %v53_v17, %v37_v16  ;;  %v215_v28 = vld [vmem:[%s1371_s3 + $0x48] sm:$0xff]  ;;  %717 = vmatpush3.msra.mxu0 %v254_v5  ;;  %749 = vmatpush3.msra.mxu1 %v254_v5  ;;  %v209_v42 = vld [vmem:[%s1371_s3 + $0x18] sm:$0xff]  ;;  %v240_v45 = vmul.f32 %v224_v36, %v881_v35 }
   0xa   :  { %v214_v21 = vld [vmem:[%s1371_s3 + $0x40] sm:$0xff]  ;;  %v231_v30 = vmul.f32 %v215_v28, %v199_v27  ;;  %v39_v43 = vld [vmem:[%s1372_s4 + $0x50] sm:$0xff]  ;;  %v225_v46 = vmul.f32 %v209_v42, %v193_v39  ;;  %v40_v50 = vld [vmem:[%s1372_s4 + $0x58] sm:$0xff] }
   0xb   :  { %v230_v25 = vmul.f32 %v214_v21, %v198_v18  ;;  %718 = vmatprep.mubr.msk.f32.mxu0 %vm141_vm0, %v238_v19  ;;  %v55_v44 = vld [vmem:[%s1373_s5 + $0x50] sm:$0xff]  ;;  %v56_v52 = vld [vmem:[%s1373_s5 + $0x58] sm:$0xff]  ;;  %v33_v58 = vld [vmem:[%s1372_s4 + $0x20] sm:$0xff] }
   0xc   :  { %719 = vmatmul.mubr.msk.f32.vlgmr.msra.gmra.mxu0 %vm141_vm0, %v239_v24  ;;  %v247_v40 = vmul.f32 %v231_v30, %v859_v26  ;;  %v907_v47 = vmul.f32 %v55_v44, %v39_v43  ;;  %v200_v48 = vld [vmem:[%s1370_s2 + $0x50] sm:$0xff]  ;;  %v201_v53 = vld [vmem:[%s1370_s2 + $0x58] sm:$0xff]  ;;  %v241_v55 = vmul.f32 %v225_v46, %v894_v41  ;;  %v930_v56 = vmul.f32 %v56_v52, %v40_v50  ;;  %v49_v59 = vld [vmem:[%s1373_s5 + $0x20] sm:$0xff] }
   0xd   :  { %v246_v34 = vmul.f32 %v230_v25, %v847_v20  ;;  %v216_v49 = vld [vmem:[%s1371_s3 + $0x50] sm:$0xff]  ;;  %v217_v54 = vld [vmem:[%s1371_s3 + $0x58] sm:$0xff]  ;;  %721 = vmatprep.mubr.msk.f32.mxu0 %vm141_vm0, %v240_v45  ;;  %v194_v60 = vld [vmem:[%s1370_s2 + $0x20] sm:$0xff]  ;;  %v942_v62 = vmul.f32 %v49_v59, %v33_v58 }
   0xe   :  { %v232_v51 = vmul.f32 %v216_v49, %v200_v48  ;;  %v233_v57 = vmul.f32 %v217_v54, %v201_v53  ;;  %v210_v63 = vld [vmem:[%s1371_s3 + $0x20] sm:$0xff]  ;;  %v34_v0 = vld [vmem:[%s1372_s4 + $0x28] sm:$0xff]  ;;  %v35_v24 = vld [vmem:[%s1372_s4 + $0x30] sm:$0xff] }
   0xf   :  { %730 = vmatprep.mubr.msk.f32.mxu1 %vm141_vm0, %v246_v34  ;;  %v50_v1 = vld [vmem:[%s1373_s5 + $0x28] sm:$0xff]  ;;  %v226_v3 = vmul.f32 %v210_v63, %v194_v60  ;;  %v41_v8 = vld [vmem:[%s1372_s4 + $0x60] sm:$0xff]  ;;  %v51_v25 = vld [vmem:[%s1373_s5 + $0x30] sm:$0xff] }
  0x10   :  { %731 = vmatmul.mubr.msk.f32.vlgmr.msra.gmra.mxu1 %vm141_vm0, %v247_v40  ;;  %v248_v61 = vmul.f32 %v232_v51, %v907_v47  ;;  %722 = vmatmul.mubr.msk.f32.gmra.mxu0 %vm141_vm0, %v241_v55  ;;  %v249_v2 = vmul.f32 %v233_v57, %v930_v56  ;;  %v955_v4 = vmul.f32 %v50_v1, %v34_v0  ;;  %v195_v5 = vld [vmem:[%s1370_s2 + $0x28] sm:$0xff]  ;;  %v57_v10 = vld [vmem:[%s1373_s5 + $0x60] sm:$0xff]  ;;  %v196_v30 = vld [vmem:[%s1370_s2 + $0x30] sm:$0xff] }
  0x11   :  { %v211_v7 = vld [vmem:[%s1371_s3 + $0x28] sm:$0xff]  ;;  %v202_v11 = vld [vmem:[%s1370_s2 + $0x60] sm:$0xff]  ;;  %v242_v13 = vmul.f32 %v226_v3, %v942_v62  ;;  %v978_v15 = vmul.f32 %v57_v10, %v41_v8  ;;  %v1003_v29 = vmul.f32 %v51_v25, %v35_v24  ;;  %v212_v31 = vld [vmem:[%s1371_s3 + $0x30] sm:$0xff] }
  0x12   :  { %733 = vmatprep.mubr.msk.f32.mxu1 %vm141_vm0, %v248_v61  ;;  %v227_v9 = vmul.f32 %v211_v7, %v195_v5  ;;  %v218_v12 = vld [vmem:[%s1371_s3 + $0x60] sm:$0xff]  ;;  %v42_v17 = vld [vmem:[%s1372_s4 + $0x68] sm:$0xff]  ;;  %v36_v32 = vld [vmem:[%s1372_s4 + $0x38] sm:$0xff]  ;;  %v228_v33 = vmul.f32 %v212_v31, %v196_v30 }
  0x13   :  { %v234_v16 = vmul.f32 %v218_v12, %v202_v11  ;;  %v58_v18 = vld [vmem:[%s1373_s5 + $0x68] sm:$0xff]  ;;  %724 = vmatprep.mubr.msk.f32.mxu0 %vm141_vm0, %v242_v13  ;;  %v52_v34 = vld [vmem:[%s1373_s5 + $0x38] sm:$0xff]  ;;  %v43_v42 = vld [vmem:[%s1372_s4 + $0x70] sm:$0xff] }
  0x14   :  { %734 = vmatmul.mubr.msk.f32.gmra.mxu1 %vm141_vm0, %v249_v2  ;;  %v203_v19 = vld [vmem:[%s1370_s2 + $0x68] sm:$0xff]  ;;  %v243_v21 = vmul.f32 %v227_v9, %v955_v4  ;;  %v990_v22 = vmul.f32 %v58_v18, %v42_v17  ;;  %v197_v36 = vld [vmem:[%s1370_s2 + $0x38] sm:$0xff]  ;;  %v1026_v39 = vmul.f32 %v52_v34, %v36_v32  ;;  %v59_v43 = vld [vmem:[%s1373_s5 + $0x70] sm:$0xff]  ;;  %v244_v45 = vmul.f32 %v228_v33, %v1003_v29 }
  0x15   :  { %v219_v23 = vld [vmem:[%s1371_s3 + $0x68] sm:$0xff]  ;;  %v250_v27 = vmul.f32 %v234_v16, %v978_v15  ;;  %v213_v37 = vld [vmem:[%s1371_s3 + $0x38] sm:$0xff]  ;;  %v204_v44 = vld [vmem:[%s1370_s2 + $0x70] sm:$0xff]  ;;  %v1038_v46 = vmul.f32 %v59_v43, %v43_v42 }
  0x16   :  { %v235_v28 = vmul.f32 %v219_v23, %v203_v19  ;;  %725 = vmatmul.mubr.msk.f32.gmra.mxu0 %vm141_vm0, %v243_v21  ;;  %v229_v40 = vmul.f32 %v213_v37, %v197_v36  ;;  %v220_v48 = vld [vmem:[%s1371_s3 + $0x70] sm:$0xff]  ;;  %v44_v49 = vld [vmem:[%s1372_s4 + $0x78] sm:$0xff]  ;;  %v77_v60 = vld [vmem:[%s1374_s0] sm:$0xff] }
  0x17   :  { %736 = vmatprep.mubr.msk.f32.mxu1 %vm141_vm0, %v250_v27  ;;  %v60_v50 = vld [vmem:[%s1373_s5 + $0x78] sm:$0xff]  ;;  %v236_v52 = vmul.f32 %v220_v48, %v204_v44  ;;  %v79_v57 = vld [vmem:[%s1374_s0 + $0x10] sm:$0xff]  ;;  %727 = vmatprep.mubr.msk.f32.mxu0 %vm141_vm0, %v244_v45  ;;  %v93_v61 = vld [vmem:[%s1375_s1] sm:$0xff] }
  0x18   :  { %v251_v38 = vmul.f32 %v235_v28, %v990_v22  ;;  %v245_v51 = vmul.f32 %v229_v40, %v1026_v39  ;;  %v1051_v53 = vmul.f32 %v60_v50, %v44_v49  ;;  %v205_v54 = vld [vmem:[%s1370_s2 + $0x78] sm:$0xff]  ;;  %v95_v59 = vld [vmem:[%s1375_s1 + $0x10] sm:$0xff]  ;;  %v109_v1 = vmul.f32 %v93_v61, %v77_v60  ;;  %v78_v5 = vld [vmem:[%s1374_s0 + $0x8] sm:$0xff] }
  0x19   :  { %v221_v55 = vld [vmem:[%s1371_s3 + $0x78] sm:$0xff]  ;;  %v252_v63 = vmul.f32 %v236_v52, %v1038_v46  ;;  %v111_v0 = vmul.f32 %v95_v59, %v79_v57  ;;  %v94_v9 = vld [vmem:[%s1375_s1 + $0x8] sm:$0xff]  ;;  %v81_v18 = vld [vmem:[%s1374_s0 + $0x20] sm:$0xff] }
  0x1a   :  { %737 = vmatmul.mubr.msk.f32.gmra.mxu1 %vm141_vm0, %v251_v38  ;;  %v237_v58 = vmul.f32 %v221_v55, %v205_v54  ;;  %728 = vmatmul.mubr.msk.f32.gmra.mxu0 %vm141_vm0, %v245_v51  ;;  %v80_v2 = vld [vmem:[%s1374_s0 + $0x18] sm:$0xff]  ;;  %v82_v10 = vld [vmem:[%s1374_s0 + $0x28] sm:$0xff]  ;;  %v125_v13 = vmul.f32 %v109_v1, %v815_v6  ;;  %v110_v16 = vmul.f32 %v94_v9, %v78_v5  ;;  %v97_v19 = vld [vmem:[%s1375_s1 + $0x20] sm:$0xff] }
  0x1b   :  { %v96_v3 = vld [vmem:[%s1375_s1 + $0x18] sm:$0xff]  ;;  %v98_v11 = vld [vmem:[%s1375_s1 + $0x28] sm:$0xff]  ;;  %739 = vmatprep.mubr.msk.f32.mxu1 %vm141_vm0, %v252_v63  ;;  %v127_v12 = vmul.f32 %v111_v0, %v881_v35  ;;  %v113_v23 = vmul.f32 %v97_v19, %v81_v18  ;;  %v83_v24 = vld [vmem:[%s1374_s0 + $0x30] sm:$0xff] }
  0x1c   :  { %v253_v7 = vmul.f32 %v237_v58, %v1051_v53  ;;  %v112_v8 = vmul.f32 %v96_v3, %v80_v2  ;;  %v114_v17 = vmul.f32 %v98_v11, %v82_v10  ;;  %v84_v21 = vld [vmem:[%s1374_s0 + $0x38] sm:$0xff]  ;;  %v99_v25 = vld [vmem:[%s1375_s1 + $0x30] sm:$0xff]  ;;  %v142_v28 = vsel %vm141_vm0, %v125_v13, 0.0  ;;  %v86_v37 = vld [vmem:[%s1374_s0 + $0x48] sm:$0xff] }
  0x1d   :  { %v100_v6 = vld [vmem:[%s1375_s1 + $0x38] sm:$0xff]  ;;  %v148_v27 = vsel %vm141_vm0, %v127_v12, 0.0  ;;  %v126_v30 = vmul.f32 %v110_v16, %v835_v14  ;;  %143 = vadd.xlane.f32.xlu0 %v142_v28  ;;  %v129_v33 = vmul.f32 %v113_v23, %v942_v62  ;;  %v115_v36 = vmul.f32 %v99_v25, %v83_v24  ;;  %v102_v14 = vld [vmem:[%s1375_s1 + $0x48] sm:$0xff]  ;;  %v85_v38 = vld [vmem:[%s1374_s0 + $0x40] sm:$0xff] }
  0x1e   :  { %740 = vmatmul.mubr.msk.f32.gmra.mxu1 %vm141_vm0, %v253_v7  ;;  %v128_v35 = vmul.f32 %v112_v8, %v894_v41  ;;  %149 = vadd.xlane.f32.xlu1 %v148_v27  ;;  %v130_v31 = vmul.f32 %v114_v17, %v955_v4  ;;  %v116_v34 = vmul.f32 %v100_v6, %v84_v21  ;;  %v101_v4 = vld [vmem:[%s1375_s1 + $0x40] sm:$0xff]  ;;  %v88_v48 = vld [vmem:[%s1374_s0 + $0x58] sm:$0xff]  ;;  %v87_v50 = vld [vmem:[%s1374_s0 + $0x50] sm:$0xff] }
  0x1f   :  { %v145_v32 = vsel %vm141_vm0, %v126_v30, 0.0  ;;  %v118_v40 = vmul.f32 %v102_v14, %v86_v37  ;;  %v154_v42 = vsel %vm141_vm0, %v129_v33, 0.0  ;;  %v131_v44 = vmul.f32 %v115_v36, %v1003_v29  ;;  %v104_v49 = vld [vmem:[%s1375_s1 + $0x58] sm:$0xff]  ;;  %v103_v51 = vld [vmem:[%s1375_s1 + $0x50] sm:$0xff]  ;;  %v90_v58 = vld [vmem:[%s1374_s0 + $0x68] sm:$0xff] }
  0x20   :  { %v151_v41 = vsel %vm141_vm0, %v128_v35, 0.0  ;;  %v157_v62 = vsel %vm141_vm0, %v130_v31, 0.0  ;;  %v132_v43 = vmul.f32 %v116_v34, %v1026_v39  ;;  %v117_v45 = vmul.f32 %v101_v4, %v85_v38  ;;  %v106_v59 = vld [vmem:[%s1375_s1 + $0x68] sm:$0xff]  ;;  %v105_v60 = vld [vmem:[%s1375_s1 + $0x60] sm:$0xff]  ;;  %v92_v3 = vld [vmem:[%s1374_s0 + $0x78] sm:$0xff] }
  0x21   :  { %146 = vadd.xlane.f32.xlu0 %v145_v32  ;;  %v134_v29 = vmul.f32 %v118_v40, %v859_v26  ;;  %v120_v39 = vmul.f32 %v104_v49, %v88_v48  ;;  %v160_v54 = vsel %vm141_vm0, %v131_v44, 0.0  ;;  %v119_v57 = vmul.f32 %v103_v51, %v87_v50  ;;  %v89_v26 = vld [vmem:[%s1374_s0 + $0x60] sm:$0xff]  ;;  %v108_v5 = vld [vmem:[%s1375_s1 + $0x78] sm:$0xff]  ;;  %v107_v7 = vld [vmem:[%s1375_s1 + $0x70] sm:$0xff] }
  0x22   :  { %152 = vadd.xlane.f32.xlu1 %v151_v41  ;;  %v163_v52 = vsel %vm141_vm0, %v132_v43, 0.0  ;;  %v133_v55 = vmul.f32 %v117_v45, %v847_v20  ;;  %v122_v61 = vmul.f32 %v106_v59, %v90_v58  ;;  %v121_v2 = vmul.f32 %v105_v60, %v89_v26 }
  0x23   :  { %v136_v20 = vmul.f32 %v120_v39, %v930_v56  ;;  %v169_v63 = vsel %vm141_vm0, %v134_v29, 0.0  ;;  %v135_v1 = vmul.f32 %v119_v57, %v907_v47  ;;  %v91_v56 = vld [vmem:[%s1374_s0 + $0x70] sm:$0xff]  ;;  %v124_v11 = vmul.f32 %v108_v5, %v92_v3 }
  0x24   :  { %v166_v0 = vsel %vm141_vm0, %v133_v55, 0.0  ;;  %v138_v8 = vmul.f32 %v122_v61, %v990_v22  ;;  %v137_v10 = vmul.f32 %v121_v2, %v978_v15  ;;  %v123_v12 = vmul.f32 %v107_v7, %v91_v56  ;;  %v1196_v15 = vld [vmem:[%s1376_s7] ss:$0 sm:$0xff] }
  0x25   :  { %155 = vadd.xlane.f32.xlu0 %v154_v42  ;;  %v175_v47 = vsel %vm141_vm0, %v136_v20, 0.0  ;;  %v172_v9 = vsel %vm141_vm0, %v135_v1, 0.0  ;;  %v140_v17 = vmul.f32 %v124_v11, %v1051_v53 }
  0x26   :  { %158 = vadd.xlane.f32.xlu1 %v157_v62  ;;  %v181_v13 = vsel %vm141_vm0, %v138_v8, 0.0  ;;  %v178_v16 = vsel %vm141_vm0, %v137_v10, 0.0  ;;  %v139_v18 = vmul.f32 %v123_v12, %v1038_v46 }
  0x27   :  { %v187_v22 = vsel %vm141_vm0, %v140_v17, 0.0 }
  0x28   :  { %v184_v19 = vsel %vm141_vm0, %v139_v18, 0.0 }
  0x29   :  { %161 = vadd.xlane.f32.xlu0 %v160_v54 }
  0x2a   :  { %164 = vadd.xlane.f32.xlu1 %v163_v52 }
  0x2d   :  { %167 = vadd.xlane.f32.xlu0 %v166_v0 }
  0x2e   :  { %170 = vadd.xlane.f32.xlu1 %v169_v63 }
  0x31   :  { %173 = vadd.xlane.f32.xlu0 %v172_v9 }
  0x32   :  { %176 = vadd.xlane.f32.xlu1 %v175_v47 }
  0x35   :  { %179 = vadd.xlane.f32.xlu0 %v178_v16 }
  0x36   :  { %182 = vadd.xlane.f32.xlu1 %v181_v13 }
  0x39   :  { %185 = vadd.xlane.f32.xlu0 %v184_v19 }
  0x3a   :  { %188 = vadd.xlane.f32.xlu1 %v187_v22 }
  0xa6   :  { %v144_v56 = vpop.xlane.xlu0 %143 }
  0xa7   :  { %v1246_v5 = vpop.xlane.xlu1 %149 }
  0xaa   :  { %v147_v47 = vpop.xlane.xlu0 %146 }
  0xab   :  { %v153_v7 = vpop.xlane.xlu1 %152 }
  0xae   :  { %v1250_v9 = vpop.xlane.xlu0 %155 }
  0xaf   :  { %v1248_v8 = vpop.xlane.xlu1 %158 }
  0xb2   :  { %v1254_v11 = vpop.xlane.xlu0 %161 }
  0xb3   :  { %v1252_v10 = vpop.xlane.xlu1 %164 }
  0xb6   :  { %v168_v13 = vpop.xlane.xlu0 %167 }
  0xb7   :  { %v171_v12 = vpop.xlane.xlu1 %170 }
  0xba   :  { %v174_v17 = vpop.xlane.xlu0 %173 }
  0xbb   :  { %v177_v16 = vpop.xlane.xlu1 %176 }
  0xbe   :  { %v1258_v22 = vpop.xlane.xlu0 %179 }
  0xbf   :  { %v1256_v18 = vpop.xlane.xlu1 %182 }
  0xc3   :  { %v1260_v19 = vpop.xlane.xlu1 %188 }
  0xcc   :  { %v720_v21 = vpop.f32.mrf.mxu0 }
  0xcd   :  { %v385_v35 = vadd.f32 %v720_v21, %v1196_v15 }
  0xce   :  { %v379_v23 = vpop.f32.mrf.mxu0 }
  0xcf   :  { %v380_v46 = vadd.f32 %v1196_v15, %v379_v23  ;;  %572 = vrot.lane.b32.xlu1 %v385_v35, %s751_s9  ;;  %v475_v27 = vmax.f32 %v385_v35, 0.0 }
  0xd0   :  { %v732_v53 = vpop.f32.mrf.mxu1  ;;  %v723_v30 = vpop.f32.mrf.mxu0 }
  0xd1   :  { %v425_v6 = vadd.f32 %v732_v53, %v1196_v15  ;;  %570 = vrot.lane.b32.xlu0 %v380_v46, %s751_s9  ;;  %v474_v28 = vmax.f32 %v380_v46, 0.0  ;;  %v395_v32 = vadd.f32 %v723_v30, %v1196_v15  ;;  %v459_v46 = vmax.f32 %v147_v47, 0.0 }
  0xd2   :  { %v419_v24 = vpop.f32.mrf.mxu1  ;;  %v389_v33 = vpop.f32.mrf.mxu0  ;;  %v467_v30 = vmax.f32 %v171_v12, 0.0 }
  0xd3   :  { %v420_v25 = vadd.f32 %v1196_v15, %v419_v24  ;;  %588 = vrot.lane.b32.xlu1 %v425_v6, %s751_s9  ;;  %v483_v41 = vmax.f32 %v425_v6, 0.0  ;;  %v390_v36 = vadd.f32 %v1196_v15, %v389_v33  ;;  %v477_v62 = vmax.f32 %v395_v32, 0.0 }
  0xd4   :  { %v735_v34 = vpop.f32.mrf.mxu1  ;;  %v458_v24 = vmax.f32 %v144_v56, 0.0  ;;  %v466_v33 = vmax.f32 %v168_v13, 0.0 }
  0xd5   :  { %586 = vrot.lane.b32.xlu0 %v420_v25, %s751_s9  ;;  %v482_v31 = vmax.f32 %v420_v25, 0.0  ;;  %v435_v37 = vadd.f32 %v735_v34, %v1196_v15  ;;  %v476_v49 = vmax.f32 %v390_v36, 0.0 }
  0xd6   :  { %v429_v14 = vpop.f32.mrf.mxu1  ;;  %v726_v38 = vpop.f32.mrf.mxu0 }
  0xd7   :  { %508 = vrot.lane.b32.xlu1 %v475_v27, %s751_s9  ;;  %v430_v4 = vadd.f32 %v1196_v15, %v429_v14  ;;  %v485_v44 = vmax.f32 %v435_v37, 0.0  ;;  %v405_v51 = vadd.f32 %v726_v38, %v1196_v15 }
  0xd8   :  { %v399_v40 = vpop.f32.mrf.mxu0 }
  0xd9   :  { %506 = vrot.lane.b32.xlu0 %v474_v28, %s751_s9  ;;  %v484_v43 = vmax.f32 %v430_v4, 0.0  ;;  %v400_v45 = vadd.f32 %v1196_v15, %v399_v40  ;;  %v479_v58 = vmax.f32 %v405_v51, 0.0 }
  0xda   :  { %v738_v42 = vpop.f32.mrf.mxu1  ;;  %v729_v29 = vpop.f32.mrf.mxu0 }
  0xdb   :  { %524 = vrot.lane.b32.xlu1 %v483_v41, %s751_s9  ;;  %v478_v39 = vmax.f32 %v400_v45, 0.0  ;;  %v445_v52 = vadd.f32 %v738_v42, %v1196_v15  ;;  %v415_v63 = vadd.f32 %v729_v29, %v1196_v15 }
  0xdc   :  { %v439_v48 = vpop.f32.mrf.mxu1  ;;  %v409_v54 = vpop.f32.mrf.mxu0 }
  0xdd   :  { %522 = vrot.lane.b32.xlu0 %v482_v31, %s751_s9  ;;  %v440_v50 = vadd.f32 %v1196_v15, %v439_v48  ;;  %v410_v59 = vadd.f32 %v1196_v15, %v409_v54  ;;  %v487_v60 = vmax.f32 %v445_v52, 0.0  ;;  %v481_v1 = vmax.f32 %v415_v63, 0.0 }
  0xde   :  { %v741_v55 = vpop.f32.mrf.mxu1 }
  0xdf   :  { %576 = vrot.lane.b32.xlu1 %v395_v32, %s751_s9  ;;  %v486_v57 = vmax.f32 %v440_v50, 0.0  ;;  %v480_v20 = vmax.f32 %v410_v59, 0.0  ;;  %v455_v2 = vadd.f32 %v741_v55, %v1196_v15 }
  0xe0   :  { %v449_v26 = vpop.f32.mrf.mxu1 }
  0xe1   :  { %574 = vrot.lane.b32.xlu0 %v390_v36, %s751_s9  ;;  %v450_v61 = vadd.f32 %v1196_v15, %v449_v26  ;;  %v489_v3 = vmax.f32 %v455_v2, 0.0  ;;  %v1262_v15 = vpop.xlane.xlu0 %185 }
  0xe3   :  { %592 = vrot.lane.b32.xlu1 %v435_v37, %s751_s9  ;;  %v488_v0 = vmax.f32 %v450_v61, 0.0 }
  0xe5   :  { %590 = vrot.lane.b32.xlu0 %v430_v4, %s751_s9 }
  0xe7   :  { %512 = vrot.lane.b32.xlu1 %v477_v62, %s751_s9 }
  0xe9   :  { %526 = vrot.lane.b32.xlu0 %v484_v43, %s751_s9  ;;  %v461_v43 = vmax.f32 %v153_v7, 0.0  ;;  %v463_v7 = vmax.f32 %v1248_v8, 0.0 }
  0xeb   :  { %528 = vrot.lane.b32.xlu1 %v485_v44, %s751_s9 }
  0xed   :  { %578 = vrot.lane.b32.xlu0 %v400_v45, %s751_s9  ;;  %v468_v45 = vmax.f32 %v174_v17, 0.0 }
  0xef   :  { %510 = vrot.lane.b32.xlu1 %v476_v49, %s751_s9 }
  0xf1   :  { %594 = vrot.lane.b32.xlu0 %v440_v50, %s751_s9 }
  0xf3   :  { %580 = vrot.lane.b32.xlu1 %v405_v51, %s751_s9  ;;  %v469_v51 = vmax.f32 %v177_v16, 0.0 }
  0xf5   :  { %514 = vrot.lane.b32.xlu0 %v478_v39, %s751_s9 }
  0xf7   :  { %596 = vrot.lane.b32.xlu1 %v445_v52, %s751_s9 }
  0xf9   :  { %530 = vrot.lane.b32.xlu0 %v486_v57, %s751_s9 }
  0xfb   :  { %516 = vrot.lane.b32.xlu1 %v479_v58, %s751_s9  ;;  %v460_v58 = vmax.f32 %v1246_v5, 0.0  ;;  %v470_v5 = vmax.f32 %v1258_v22, 0.0  ;;  %v471_v22 = vmax.f32 %v1256_v18, 0.0 }
  0xfd   :  { %582 = vrot.lane.b32.xlu0 %v410_v59, %s751_s9 }
  0xff   :  { %532 = vrot.lane.b32.xlu1 %v487_v60, %s751_s9 }
 0x101   :  { %518 = vrot.lane.b32.xlu0 %v480_v20, %s751_s9 }
 0x103   :  { %584 = vrot.lane.b32.xlu1 %v415_v63, %s751_s9  ;;  %v462_v63 = vmax.f32 %v1250_v9, 0.0 }
 0x105   :  { %534 = vrot.lane.b32.xlu0 %v488_v0, %s751_s9 }
 0x107   :  { %520 = vrot.lane.b32.xlu1 %v481_v1, %s751_s9 }
 0x109   :  { %598 = vrot.lane.b32.xlu0 %v450_v61, %s751_s9 }
 0x10b   :  { %536 = vrot.lane.b32.xlu1 %v489_v3, %s751_s9 }
 0x10f   :  { %600 = vrot.lane.b32.xlu1 %v455_v2, %s751_s9 }
 0x141   :  { %v573_v21 = vpop.permute.xlu1 %572 }
 0x143   :  { %v571_v35 = vpop.permute.xlu0 %570 }
 0x145   :  { %v589_v23 = vpop.permute.xlu1 %588 }
 0x147   :  { %v587_v53 = vpop.permute.xlu0 %586 }
 0x149   :  { %v509_v6 = vpop.permute.xlu1 %508 }
 0x14a   :  { %v620_v25 = vsel %vm618_vm1, %v459_v46, %v509_v6 }
 0x14b   :  { %v637_v27 = vsel %vm635_vm2, %v620_v25, %v573_v21  ;;  %v507_v28 = vpop.permute.xlu0 %506  ;;  %v464_v21 = vmax.f32 %v1254_v11, 0.0  ;;  %v472_v25 = vmax.f32 %v1262_v15, 0.0  ;;  %v473_v15 = vmax.f32 %v1260_v19, 0.0 }
 0x14c   :  { %654 = vst.msk [vmem:[%s1377_s8 + $0x8] sm:$0xff] %vm652_vm3, %v637_v27  ;;  %v619_v41 = vsel %vm618_vm1, %v458_v24, %v507_v28  ;;  %v465_v24 = vmax.f32 %v1252_v10, 0.0 }
 0x14d   :  { %v636_v31 = vsel %vm635_vm2, %v619_v41, %v571_v35  ;;  %v525_v32 = vpop.permute.xlu1 %524 }
 0x14e   :  { %653 = vst.msk [vmem:[%s1377_s8] sm:$0xff] %vm652_vm3, %v636_v31  ;;  %v628_v34 = vsel %vm618_vm1, %v467_v30, %v525_v32 }
 0x14f   :  { %v645_v36 = vsel %vm635_vm2, %v628_v34, %v589_v23  ;;  %v523_v37 = vpop.permute.xlu0 %522 }
 0x150   :  { %662 = vst.msk [vmem:[%s1377_s8 + $0x48] sm:$0xff] %vm652_vm3, %v645_v36  ;;  %v627_v14 = vsel %vm618_vm1, %v466_v33, %v523_v37 }
 0x151   :  { %v644_v38 = vsel %vm635_vm2, %v627_v14, %v587_v53  ;;  %v577_v4 = vpop.permute.xlu1 %576 }
 0x152   :  { %661 = vst.msk [vmem:[%s1377_s8 + $0x40] sm:$0xff] %vm652_vm3, %v644_v38 }
 0x153   :  { %v575_v62 = vpop.permute.xlu0 %574 }
 0x155   :  { %v593_v40 = vpop.permute.xlu1 %592 }
 0x157   :  { %v591_v42 = vpop.permute.xlu0 %590 }
 0x159   :  { %v513_v44 = vpop.permute.xlu1 %512 }
 0x15a   :  { %v622_v48 = vsel %vm618_vm1, %v461_v43, %v513_v44 }
 0x15b   :  { %v639_v49 = vsel %vm635_vm2, %v622_v48, %v577_v4  ;;  %v527_v50 = vpop.permute.xlu0 %526 }
 0x15c   :  { %656 = vst.msk [vmem:[%s1377_s8 + $0x18] sm:$0xff] %vm652_vm3, %v639_v49  ;;  %v629_v29 = vsel %vm618_vm1, %v468_v45, %v527_v50 }
 0x15d   :  { %v646_v39 = vsel %vm635_vm2, %v629_v29, %v591_v42  ;;  %v529_v52 = vpop.permute.xlu1 %528 }
 0x15e   :  { %663 = vst.msk [vmem:[%s1377_s8 + $0x50] sm:$0xff] %vm652_vm3, %v646_v39  ;;  %v630_v54 = vsel %vm618_vm1, %v469_v51, %v529_v52 }
 0x15f   :  { %v647_v55 = vsel %vm635_vm2, %v630_v54, %v593_v40  ;;  %v579_v57 = vpop.permute.xlu0 %578 }
 0x160   :  { %664 = vst.msk [vmem:[%s1377_s8 + $0x58] sm:$0xff] %vm652_vm3, %v647_v55 }
 0x161   :  { %v511_v59 = vpop.permute.xlu1 %510 }
 0x162   :  { %v621_v26 = vsel %vm618_vm1, %v460_v58, %v511_v59 }
 0x163   :  { %v638_v60 = vsel %vm635_vm2, %v621_v26, %v575_v62  ;;  %v595_v20 = vpop.permute.xlu0 %594 }
 0x164   :  { %655 = vst.msk [vmem:[%s1377_s8 + $0x10] sm:$0xff] %vm652_vm3, %v638_v60 }
 0x165   :  { %v581_v61 = vpop.permute.xlu1 %580 }
 0x167   :  { %v515_v0 = vpop.permute.xlu0 %514 }
 0x168   :  { %v623_v1 = vsel %vm618_vm1, %v462_v63, %v515_v0 }
 0x169   :  { %v640_v2 = vsel %vm635_vm2, %v623_v1, %v579_v57  ;;  %v597_v3 = vpop.permute.xlu1 %596 }
 0x16a   :  { %657 = vst.msk [vmem:[%s1377_s8 + $0x20] sm:$0xff] %vm652_vm3, %v640_v2 }
 0x16b   :  { %v531_v56 = vpop.permute.xlu0 %530 }
 0x16c   :  { %v631_v47 = vsel %vm618_vm1, %v470_v5, %v531_v56 }
 0x16d   :  { %v648_v9 = vsel %vm635_vm2, %v631_v47, %v595_v20  ;;  %v517_v12 = vpop.permute.xlu1 %516 }
 0x16e   :  { %665 = vst.msk [vmem:[%s1377_s8 + $0x60] sm:$0xff] %vm652_vm3, %v648_v9  ;;  %v624_v13 = vsel %vm618_vm1, %v463_v7, %v517_v12 }
 0x16f   :  { %v641_v16 = vsel %vm635_vm2, %v624_v13, %v581_v61  ;;  %v583_v17 = vpop.permute.xlu0 %582 }
 0x170   :  { %658 = vst.msk [vmem:[%s1377_s8 + $0x28] sm:$0xff] %vm652_vm3, %v641_v16 }
 0x171   :  { %v533_v8 = vpop.permute.xlu1 %532 }
 0x172   :  { %v632_v35 = vsel %vm618_vm1, %v471_v22, %v533_v8 }
 0x173   :  { %v649_v23 = vsel %vm635_vm2, %v632_v35, %v597_v3  ;;  %v519_v53 = vpop.permute.xlu0 %518 }
 0x174   :  { %666 = vst.msk [vmem:[%s1377_s8 + $0x68] sm:$0xff] %vm652_vm3, %v649_v23  ;;  %v625_v18 = vsel %vm618_vm1, %v464_v21, %v519_v53 }
 0x175   :  { %v642_v46 = vsel %vm635_vm2, %v625_v18, %v583_v17  ;;  %v585_v6 = vpop.permute.xlu1 %584 }
 0x176   :  { %659 = vst.msk [vmem:[%s1377_s8 + $0x30] sm:$0xff] %vm652_vm3, %v642_v46 }
 0x177   :  { %v535_v11 = vpop.permute.xlu0 %534 }
 0x178   :  { %v633_v30 = vsel %vm618_vm1, %v472_v25, %v535_v11 }
 0x179   :  { %v521_v27 = vpop.permute.xlu1 %520 }
 0x17a   :  { %v626_v28 = vsel %vm618_vm1, %v465_v24, %v521_v27 }
 0x17b   :  { %v643_v41 = vsel %vm635_vm2, %v626_v28, %v585_v6  ;;  %v599_v31 = vpop.permute.xlu0 %598 }
 0x17c   :  { %660 = vst.msk [vmem:[%s1377_s8 + $0x38] sm:$0xff] %vm652_vm3, %v643_v41  ;;  %v650_v32 = vsel %vm635_vm2, %v633_v30, %v599_v31 }
 0x17d   :  { %667 = vst.msk [vmem:[%s1377_s8 + $0x70] sm:$0xff] %vm652_vm3, %v650_v32  ;;  %v537_v10 = vpop.permute.xlu1 %536 }
 0x17e   :  { %v634_v33 = vsel %vm618_vm1, %v473_v15, %v537_v10 }
 0x181   :  { %v601_v34 = vpop.permute.xlu1 %600 }
 0x182   :  { %v651_v36 = vsel %vm635_vm2, %v634_v33, %v601_v34 }
 0x183   :  { %668 = vst.msk [vmem:[%s1377_s8 + $0x78] sm:$0xff] %vm652_vm3, %v651_v36 }

</bundles_post_ra>
